<compile_context>
chip_gen: v7x
topology: tpu7x:2x2x1
jax: 0.10.0
libtpu: 0.0.40
codegen_flags: <defaults>
</compile_context>

<pallas_src>
import functools
import math

import jax
import jax.numpy as jnp
from jax import lax
from jax.experimental import pallas as pl
from jax.experimental.pallas import tpu as pltpu


def _pick_tile(hw: int, target: int) -> int:
    """Largest multiple of 128 that divides `hw` and is <= target, else `hw`."""
    if hw <= target:
        return hw
    if hw % 128 == 0:
        t = (target // 128) * 128
        while t >= 128:
            if hw % t == 0:
                return t
            t -= 128
    # TODO(synk): HW that is large but not a multiple of 128 falls back to a single
    # un-tiled block; add masked ragged tiles if such shapes ever matter.
    return hw


def _non_local_attn_kernel(gamma_ref,        # SMEM (1,)
                           x_cf_ref,         # (C, TQ)      residual, channels-first f32
                           q_ref,            # (TQ, Cd)     attn_dtype, pre-projected
                           k_ref,            # (TK, Cd)     attn_dtype, pre-projected
                           v_ref,            # (TK, Cd+1)   attn_dtype, last col = 1
                           wsa_ref,          # (C, Cd)      f32, scale2 folded in
                           bsa_ref,          # (C, 1)       f32
                           out_ref,          # (C, TQ)      f32
                           m_s,              # (TQ, 1)      f32 running max
                           acc_s,            # (TQ, Cd+1)   f32 [acc | running sum l]
                           *, c_div):
    ki = pl.program_id(2)

    @pl.when(ki == 0)
    def _init():
        m_s[...] = jnp.full_like(m_s, -jnp.inf)
        acc_s[...] = jnp.zeros_like(acc_s)

    # logits = q @ k^T without materializing k^T (MXU-native transposed-rhs dims).
    s = lax.dot_general(q_ref[...], k_ref[...], (((1,), (1,)), ((), ())),
                        preferred_element_type=jnp.float32)            # (TQ, TK)

    # Online softmax over the key axis.
    m_prev = m_s[...]
    m_new = jnp.maximum(m_prev, jnp.max(s, axis=-1, keepdims=True))
    alpha = jnp.exp(m_prev - m_new)                                    # (TQ, 1) f32
    # exp in the attention dtype (bf16 EUP on v6e/v7x); feeds the MXU directly.
    p = jnp.exp((s - m_new).astype(v_ref.dtype))                       # (TQ, TK)
    # Fused p@V and softmax row-sum: last column of v_ref is all-ones, so the last
    # accumulator column carries the running denominator (no XLU lane reduction).
    acc_s[...] = alpha * acc_s[...] + jnp.dot(
        p, v_ref[...], preferred_element_type=jnp.float32)
    m_s[...] = m_new

    @pl.when(ki == pl.num_programs(2) - 1)
    def _finalize():
        acc = acc_s[...]
        sa = acc[:, :c_div] * pl.reciprocal(acc[:, c_div:], approx=True)   # (TQ, Cd)
        # Output projection emitted directly in channels-first (C, TQ): lane-dense
        # stores (HW on the 128-lane axis), no output transpose in the wrapper.
        out = lax.dot_general(wsa_ref[...], sa, (((1,), (1,)), ((), ())),
                              preferred_element_type=jnp.float32)          # (C, TQ)
        out_ref[...] = gamma_ref[0] * (out + bsa_ref[...]) + x_cf_ref[...]


def non_local_forward(x_nchw, params, div_num=4, *, tq=None, tk=None,
                      attn_dtype=jnp.bfloat16, vmem_limit_bytes=None):
    """x_nchw: (B, C, H, W) float32.  Returns (B, C, H, W) float32."""
    B, C, H, W = x_nchw.shape
    assert C % div_num == 0
    Cd = C // div_num
    HW = H * W

    if tq is None:
        q_target = 512
        if B == 1 and HW >= 2 * 128:
            # v7x has 2 TensorCores; with B == 1 keep num_q >= 2 so both the
            # "parallel" grid axes together carry at least 2 units of work.
            q_target = min(q_target, max(128, HW // 2))
        TQ = _pick_tile(HW, q_target)
    else:
        TQ = tq
    TK = _pick_tile(HW, 512) if tk is None else tk
    assert HW % TQ == 0 and HW % TK == 0
    num_q, num_k = HW // TQ, HW // TK

    scale1 = 1.0 / math.sqrt(C)
    scale2 = 1.0 / math.sqrt(Cd)

    # Channels-first view is a free reshape of NCHW; it carries the residual and
    # defines the lane-dense (C, HW) output layout (no output transpose needed).
    x_cf = x_nchw.reshape(B, C, HW)

    # Fold the Weight_Scaling constants into the conv weights (biases untouched;
    # residual uses the unscaled x, matching the PyTorch module).
    wq = params["wq"].reshape(Cd, C) * scale1
    wk = params["wk"].reshape(Cd, C) * scale1
    wv = params["wv"].reshape(Cd, C) * scale1
    wsa_s = params["wsa"].reshape(C, Cd) * scale2
    bsa_col = params["bsa"].reshape(C, 1)
    gamma = params["gamma"].reshape(1).astype(jnp.float32)

    # Hoisted q/k/v 1x1 convolutions: computed once per element (instead of once per
    # query-tile x key-tile in the kernel) and delivered to the kernel as small bf16
    # (T, Cd) tiles.  Contracting directly against the channels-first view avoids
    # materializing a (B, HW, C) transposed copy of x in HBM.
    q = (jnp.einsum("bcn,dc->bnd", x_cf, wq)
         + params["bq"][None, None, :]).astype(attn_dtype)            # (B, HW, Cd)
    k = (jnp.einsum("bcn,dc->bnd", x_cf, wk)
         + params["bk"][None, None, :]).astype(attn_dtype)            # (B, HW, Cd)
    v = jnp.einsum("bcn,dc->bnd", x_cf, wv) + params["bv"][None, None, :]
    # Append an all-ones column so the p@V matmul also produces the softmax row-sum.
    v_aug = jnp.concatenate(
        [v, jnp.ones((B, HW, 1), v.dtype)], axis=-1).astype(attn_dtype)  # (B,HW,Cd+1)

    kernel = functools.partial(_non_local_attn_kernel, c_div=Cd)

    def full(shape):
        return pl.BlockSpec(shape, lambda b, qi, ki, _s=len(shape): (0,) * _s)

    cp_kwargs = dict(dimension_semantics=("parallel", "parallel", "arbitrary"))
    if vmem_limit_bytes is not None:
        # Raise the scoped-VMEM budget explicitly for big-tile configs
        # (e.g. TK up to 1024-2048 on v6e, or large C on v5e's 16 MiB default).
        cp_kwargs["vmem_limit_bytes"] = int(vmem_limit_bytes)

    out_cf = pl.pallas_call(
        kernel,
        out_shape=jax.ShapeDtypeStruct((B, C, HW), jnp.float32),
        grid_spec=pltpu.PrefetchScalarGridSpec(
            num_scalar_prefetch=0,
            grid=(B, num_q, num_k),
            in_specs=[
                pl.BlockSpec(memory_space=pltpu.SMEM),                          # gamma
                pl.BlockSpec((None, C, TQ), lambda b, qi, ki: (b, 0, qi)),      # residual
                pl.BlockSpec((None, TQ, Cd), lambda b, qi, ki: (b, qi, 0)),     # q tile
                pl.BlockSpec((None, TK, Cd), lambda b, qi, ki: (b, ki, 0)),     # k tile
                pl.BlockSpec((None, TK, Cd + 1), lambda b, qi, ki: (b, ki, 0)), # [v|1] tile
                full((C, Cd)), full((C, 1)),                                    # out proj
            ],
            out_specs=pl.BlockSpec((None, C, TQ), lambda b, qi, ki: (b, 0, qi)),
            scratch_shapes=[
                pltpu.VMEM((TQ, 1), jnp.float32),        # running max m
                pltpu.VMEM((TQ, Cd + 1), jnp.float32),   # output acc | running sum l
            ],
        ),
        compiler_params=pltpu.CompilerParams(**cp_kwargs),
    )(gamma, x_cf, q, k, v_aug, wsa_s, bsa_col)

    return out_cf.reshape(B, C, H, W)


def non_local_reference(x, params, div_num=4):
    """Pure-JAX reference mirroring the PyTorch forward exactly (NCHW)."""
    B, C, H, W = x.shape
    Cd = C // div_num
    HW = H * W
    scale1 = 1.0 / jnp.sqrt(jnp.float32(C))
    scale2 = 1.0 / jnp.sqrt(jnp.float32(Cd))
    t = x
    xs = x * scale1

    def conv1x1(inp, w, b):  # w: (out, in), b: (out,)
        return jnp.einsum("bchw,oc->bohw", inp, w) + b[None, :, None, None]

    q = conv1x1(xs, params["wq"].reshape(Cd, C), params["bq"]).reshape(B, Cd, HW)
    k = conv1x1(xs, params["wk"].reshape(Cd, C), params["bk"]).reshape(B, Cd, HW)
    v = conv1x1(xs, params["wv"].reshape(Cd, C), params["bv"]).reshape(B, Cd, HW)
    logits = jnp.einsum("bcq,bck->bqk", q, k)                 # q^T k
    attn = jax.nn.softmax(logits, axis=-1)                    # (B, HW, HW)
    sa = jnp.einsum("bci,bji->bcj", v, attn) * scale2         # v @ attn^T
    sa = sa.reshape(B, Cd, H, W)
    out = conv1x1(sa, params["wsa"].reshape(C, Cd), params["bsa"])
    return params["gamma"] * out + t


if __name__ == "__main__":
    def run_case(B, C, H, W, div_num, key, tq=None, tk=None):
        Cd = C // div_num
        ks = jax.random.split(key, 10)
        params = {
            "wq": jax.random.normal(ks[0], (Cd, C, 1, 1), jnp.float32) * 0.1,
            "bq": jax.random.normal(ks[1], (Cd,), jnp.float32) * 0.1,
            "wk": jax.random.normal(ks[2], (Cd, C, 1, 1), jnp.float32) * 0.1,
            "bk": jax.random.normal(ks[3], (Cd,), jnp.float32) * 0.1,
            "wv": jax.random.normal(ks[4], (Cd, C, 1, 1), jnp.float32) * 0.1,
            "bv": jax.random.normal(ks[5], (Cd,), jnp.float32) * 0.1,
            "wsa": jax.random.normal(ks[6], (C, Cd, 1, 1), jnp.float32) * 0.1,
            "bsa": jax.random.normal(ks[7], (C,), jnp.float32) * 0.1,
            # PyTorch inits gamma to 0 (output == input); use a nonzero value so
            # the attention path is actually exercised by the check.
            "gamma": jnp.array([0.7], jnp.float32),
        }
        x = jax.random.normal(ks[8], (B, C, H, W), jnp.float32)
        out = jax.block_until_ready(
            non_local_forward(x, params, div_num, tq=tq, tk=tk))
        ref = jax.block_until_ready(non_local_reference(x, params, div_num))
        assert out.shape == (B, C, H, W)
        err = float(jnp.max(jnp.abs(out - ref)))
        # bf16 q/k/v/p (incl. bf16 exp) with f32 MXU accumulation and approx
        # reciprocal -> slightly looser tolerance than a pure-f32 path.
        assert jnp.allclose(out, ref, atol=2e-2, rtol=2e-2), f"max abs err = {err}"

    key = jax.random.PRNGKey(0)
    k1, k2 = jax.random.split(key)
    # Single-tile path (HW = 64 < 128): grid (2, 1, 1).
    run_case(2, 8, 8, 8, 4, k1)
    # Multi-tile flash path (HW = 256, TQ = TK = 128): grid (1, 2, 2) exercises
    # the online-softmax accumulation across key tiles and multiple query tiles.
    run_case(1, 16, 16, 16, 4, k2, tq=128, tk=128)
    print("KERNEL_OK")
</pallas_src>

<mosaic_0001>
module attributes {stable_mosaic.version = 11 : i64} {
  func.func @_non_local_attn_kernel(%arg0: i32, %arg1: i32, %arg2: i32, %arg3: memref<1xf32, #tpu.memory_space<smem>>, %arg4: memref<1x8x64xf32, #tpu.memory_space<vmem>>, %arg5: memref<1x64x2xbf16, #tpu.memory_space<vmem>>, %arg6: memref<1x64x2xbf16, #tpu.memory_space<vmem>>, %arg7: memref<1x64x3xbf16, #tpu.memory_space<vmem>>, %arg8: memref<8x2xf32, #tpu.memory_space<vmem>>, %arg9: memref<8x1xf32, #tpu.memory_space<vmem>>, %arg10: memref<1x8x64xf32, #tpu.memory_space<vmem>>, %arg11: memref<64x1xf32, #tpu.memory_space<vmem>>, %arg12: memref<64x3xf32, #tpu.memory_space<vmem>>) attributes {dimension_semantics = [#tpu.dimension_semantics<parallel>, #tpu.dimension_semantics<parallel>, #tpu.dimension_semantics<arbitrary>], iteration_bounds = array<i64: 2, 1, 1>, scalar_prefetch = 0 : i64, scratch_operands = 2 : i64, tpu.core_type = #tpu.core_type<tc>, window_params = [{transform_indices = @transform_0, window_bounds = array<i64: 1>}, {transform_indices = @transform_1, window_bounds = array<i64: 1, 8, 64>}, {transform_indices = @transform_2, window_bounds = array<i64: 1, 64, 2>}, {transform_indices = @transform_3, window_bounds = array<i64: 1, 64, 2>}, {transform_indices = @transform_4, window_bounds = array<i64: 1, 64, 3>}, {pipeline_mode = #tpu.pipeline_mode<synchronous>, transform_indices = @transform_5, window_bounds = array<i64: 8, 2>}, {pipeline_mode = #tpu.pipeline_mode<synchronous>, transform_indices = @transform_6, window_bounds = array<i64: 8, 1>}, {transform_indices = @transform_7, window_bounds = array<i64: 1, 8, 64>}]} {
    %c0_i32 = arith.constant 0 : i32
    %0 = arith.cmpi eq, %arg2, %c0_i32 : i32
    %1 = arith.extui %0 : i1 to i32
    %c0_i32_0 = arith.constant 0 : i32
    %2 = arith.cmpi ne, %1, %c0_i32_0 : i32
    scf.if %2 {
      %cst_21 = arith.constant 0xFF800000 : f32
      %30 = vector.broadcast %cst_21 : f32 to vector<64x1xf32>
      %c0_22 = arith.constant 0 : index
      %c0_23 = arith.constant 0 : index
      %31 = vector.load %arg11[%c0_22, %c0_23] : memref<64x1xf32, #tpu.memory_space<vmem>>, vector<64x1xf32>
      tpu.vector_store %arg11[%c0_22, %c0_23], %30 {strides = array<i32>} : memref<64x1xf32, #tpu.memory_space<vmem>>, vector<64x1xf32>,
      %cst_24 = arith.constant 0.000000e+00 : f32
      %32 = vector.broadcast %cst_24 : f32 to vector<64x3xf32>
      %c0_25 = arith.constant 0 : index
      %c0_26 = arith.constant 0 : index
      %33 = vector.load %arg12[%c0_25, %c0_26] : memref<64x3xf32, #tpu.memory_space<vmem>>, vector<64x3xf32>
      tpu.vector_store %arg12[%c0_25, %c0_26], %32 {strides = array<i32>} : memref<64x3xf32, #tpu.memory_space<vmem>>, vector<64x3xf32>,
    } else {
    }
    %c0 = arith.constant 0 : index
    %c0_1 = arith.constant 0 : index
    %c0_2 = arith.constant 0 : index
    %3 = vector.load %arg5[%c0, %c0_1, %c0_2] : memref<1x64x2xbf16, #tpu.memory_space<vmem>>, vector<1x64x2xbf16>
    %4 = vector.shape_cast %3 : vector<1x64x2xbf16> to vector<64x2xbf16>
    %c0_3 = arith.constant 0 : index
    %c0_4 = arith.constant 0 : index
    %c0_5 = arith.constant 0 : index
    %5 = vector.load %arg6[%c0_3, %c0_4, %c0_5] : memref<1x64x2xbf16, #tpu.memory_space<vmem>>, vector<1x64x2xbf16>
    %6 = vector.shape_cast %5 : vector<1x64x2xbf16> to vector<64x2xbf16>
    %cst = arith.constant dense<0.000000e+00> : vector<64x64xf32>
    %7 = tpu.matmul %4, %6, %cst {dimension_numbers = #tpu.dot_dimension_numbers<[1], [1], [0], [0], [0, 0, 1, 0], [], []>} : vector<64x2xbf16>, vector<64x2xbf16>, vector<64x64xf32> -> vector<64x64xf32>
    %c0_6 = arith.constant 0 : index
    %c0_7 = arith.constant 0 : index
    %8 = vector.load %arg11[%c0_6, %c0_7] : memref<64x1xf32, #tpu.memory_space<vmem>>, vector<64x1xf32>
    %cst_8 = arith.constant dense<0xFF800000> : vector<64xf32>
    %9 = vector.multi_reduction <maximumf>, %7, %cst_8 [1] : vector<64x64xf32> to vector<64xf32>
    %10 = vector.shape_cast %9 : vector<64xf32> to vector<64x1xf32>
    %11 = arith.maximumf %8, %10 : vector<64x1xf32>
    %12 = arith.subf %8, %11 : vector<64x1xf32>
    %13 = math.exp %12 : vector<64x1xf32>
    %14 = vector.broadcast %11 : vector<64x1xf32> to vector<64x64xf32>
    %15 = arith.subf %7, %14 : vector<64x64xf32>
    %16 = arith.truncf %15 : vector<64x64xf32> to vector<64x64xbf16>
    %17 = math.exp %16 : vector<64x64xbf16>
    %c0_9 = arith.constant 0 : index
    %c0_10 = arith.constant 0 : index
    %18 = vector.load %arg12[%c0_9, %c0_10] : memref<64x3xf32, #tpu.memory_space<vmem>>, vector<64x3xf32>
    %19 = vector.broadcast %13 : vector<64x1xf32> to vector<64x3xf32>
    %20 = arith.mulf %19, %18 : vector<64x3xf32>
    %c0_11 = arith.constant 0 : index
    %c0_12 = arith.constant 0 : index
    %c0_13 = arith.constant 0 : index
    %21 = vector.load %arg7[%c0_11, %c0_12, %c0_13] : memref<1x64x3xbf16, #tpu.memory_space<vmem>>, vector<1x64x3xbf16>
    %22 = vector.shape_cast %21 : vector<1x64x3xbf16> to vector<64x3xbf16>
    %cst_14 = arith.constant dense<0.000000e+00> : vector<64x3xf32>
    %23 = tpu.matmul %17, %22, %cst_14 {dimension_numbers = #tpu.dot_dimension_numbers<[1], [0], [0], [1], [0, 0, 1, 1], [], []>} : vector<64x64xbf16>, vector<64x3xbf16>, vector<64x3xf32> -> vector<64x3xf32>
    %24 = arith.addf %20, %23 : vector<64x3xf32>
    %c0_15 = arith.constant 0 : index
    %c0_16 = arith.constant 0 : index
    %25 = vector.load %arg12[%c0_15, %c0_16] : memref<64x3xf32, #tpu.memory_space<vmem>>, vector<64x3xf32>
    tpu.vector_store %arg12[%c0_15, %c0_16], %24 {strides = array<i32>} : memref<64x3xf32, #tpu.memory_space<vmem>>, vector<64x3xf32>,
    %c0_17 = arith.constant 0 : index
    %c0_18 = arith.constant 0 : index
    %26 = vector.load %arg11[%c0_17, %c0_18] : memref<64x1xf32, #tpu.memory_space<vmem>>, vector<64x1xf32>
    tpu.vector_store %arg11[%c0_17, %c0_18], %11 {strides = array<i32>} : memref<64x1xf32, #tpu.memory_space<vmem>>, vector<64x1xf32>,
    %c0_i32_19 = arith.constant 0 : i32
    %27 = arith.cmpi eq, %arg2, %c0_i32_19 : i32
    %28 = arith.extui %27 : i1 to i32
    %c0_i32_20 = arith.constant 0 : i32
    %29 = arith.cmpi ne, %28, %c0_i32_20 : i32
    scf.if %29 {
      %c0_21 = arith.constant 0 : index
      %c0_22 = arith.constant 0 : index
      %30 = vector.load %arg12[%c0_21, %c0_22] : memref<64x3xf32, #tpu.memory_space<vmem>>, vector<64x3xf32>
      %31 = vector.extract_strided_slice %30 {offsets = [0, 0], sizes = [64, 2], strides = [1, 1]} : vector<64x3xf32> to vector<64x2xf32>
      %32 = vector.extract_strided_slice %30 {offsets = [0, 2], sizes = [64, 1], strides = [1, 1]} : vector<64x3xf32> to vector<64x1xf32>
      %33 = tpu.reciprocal %32 {approx = true} : vector<64x1xf32> -> vector<64x1xf32>
      %34 = vector.broadcast %33 : vector<64x1xf32> to vector<64x2xf32>
      %35 = arith.mulf %31, %34 : vector<64x2xf32>
      %c0_23 = arith.constant 0 : index
      %c0_24 = arith.constant 0 : index
      %36 = vector.load %arg8[%c0_23, %c0_24] : memref<8x2xf32, #tpu.memory_space<vmem>>, vector<8x2xf32>
      %cst_25 = arith.constant dense<0.000000e+00> : vector<8x64xf32>
      %37 = tpu.matmul %36, %35, %cst_25 {dimension_numbers = #tpu.dot_dimension_numbers<[1], [1], [0], [0], [0, 0, 1, 0], [], []>} : vector<8x2xf32>, vector<64x2xf32>, vector<8x64xf32> -> vector<8x64xf32>
      %c0_26 = arith.constant 0 : index
      %38 = memref.load %arg3[%c0_26] : memref<1xf32, #tpu.memory_space<smem>>
      %c0_27 = arith.constant 0 : index
      %c0_28 = arith.constant 0 : index
      %39 = vector.load %arg9[%c0_27, %c0_28] : memref<8x1xf32, #tpu.memory_space<vmem>>, vector<8x1xf32>
      %40 = vector.broadcast %39 : vector<8x1xf32> to vector<8x64xf32>
      %41 = arith.addf %37, %40 : vector<8x64xf32>
      %42 = vector.broadcast %38 : f32 to vector<8x64xf32>
      %43 = arith.mulf %42, %41 : vector<8x64xf32>
      %c0_29 = arith.constant 0 : index
      %c0_30 = arith.constant 0 : index
      %c0_31 = arith.constant 0 : index
      %44 = vector.load %arg4[%c0_29, %c0_30, %c0_31] : memref<1x8x64xf32, #tpu.memory_space<vmem>>, vector<1x8x64xf32>
      %45 = vector.shape_cast %44 : vector<1x8x64xf32> to vector<8x64xf32>
      %46 = arith.addf %43, %45 : vector<8x64xf32>
      %c0_32 = arith.constant 0 : index
      %c0_33 = arith.constant 0 : index
      %c0_34 = arith.constant 0 : index
      %47 = vector.load %arg10[%c0_32, %c0_33, %c0_34] : memref<1x8x64xf32, #tpu.memory_space<vmem>>, vector<1x8x64xf32>
      %48 = vector.shape_cast %47 : vector<1x8x64xf32> to vector<8x64xf32>
      %49 = vector.shape_cast %46 : vector<8x64xf32> to vector<1x8x64xf32>
      tpu.vector_store %arg10[%c0_32, %c0_33, %c0_34], %49 {strides = array<i32>} : memref<1x8x64xf32, #tpu.memory_space<vmem>>, vector<1x8x64xf32>,
    } else {
    }
    return
  }
  func.func @transform_0(%arg0: i32, %arg1: i32, %arg2: i32) -> i32 {
    %c0_i32 = arith.constant 0 : i32
    %c0_i32_0 = arith.constant 0 : i32
    return %c0_i32 : i32
  }
  func.func @transform_1(%arg0: i32, %arg1: i32, %arg2: i32) -> (i32, i32, i32) {
    %c0_i32 = arith.constant 0 : i32
    %c0_i32_0 = arith.constant 0 : i32
    return %arg0, %c0_i32, %arg1 : i32, i32, i32
  }
  func.func @transform_2(%arg0: i32, %arg1: i32, %arg2: i32) -> (i32, i32, i32) {
    %c0_i32 = arith.constant 0 : i32
    %c0_i32_0 = arith.constant 0 : i32
    return %arg0, %arg1, %c0_i32 : i32, i32, i32
  }
  func.func @transform_3(%arg0: i32, %arg1: i32, %arg2: i32) -> (i32, i32, i32) {
    %c0_i32 = arith.constant 0 : i32
    %c0_i32_0 = arith.constant 0 : i32
    return %arg0, %arg2, %c0_i32 : i32, i32, i32
  }
  func.func @transform_4(%arg0: i32, %arg1: i32, %arg2: i32) -> (i32, i32, i32) {
    %c0_i32 = arith.constant 0 : i32
    %c0_i32_0 = arith.constant 0 : i32
    return %arg0, %arg2, %c0_i32 : i32, i32, i32
  }
  func.func @transform_5(%arg0: i32, %arg1: i32, %arg2: i32) -> (i32, i32) {
    %c0_i32 = arith.constant 0 : i32
    %c0_i32_0 = arith.constant 0 : i32
    %c0_i32_1 = arith.constant 0 : i32
    return %c0_i32, %c0_i32_0 : i32, i32
  }
  func.func @transform_6(%arg0: i32, %arg1: i32, %arg2: i32) -> (i32, i32) {
    %c0_i32 = arith.constant 0 : i32
    %c0_i32_0 = arith.constant 0 : i32
    %c0_i32_1 = arith.constant 0 : i32
    return %c0_i32, %c0_i32_0 : i32, i32
  }
  func.func @transform_7(%arg0: i32, %arg1: i32, %arg2: i32) -> (i32, i32, i32) {
    %c0_i32 = arith.constant 0 : i32
    %c0_i32_0 = arith.constant 0 : i32
    return %arg0, %c0_i32, %arg1 : i32, i32, i32
  }
}

</mosaic_0001>

<bundles_post_ra>
// kernel: tpu_custom_call.1
= control target key start
LH: loop header
LB: loop body
LE: loop exit
PB: predicated region body
PF: predicated region fallthrough
CT: control target
= control target key end

     0   :  { %s1896_s0 = inlined_call_operand.<no memory space> [shape: f32[1], index: 0, kind: input, shape index: {}]   ;;  %s1897_s1 = inlined_call_operand.vmem [shape: f32[2,8,64], index: 1, kind: input, shape index: {}]   ;;  %s1898_s2 = inlined_call_operand.vmem [shape: bf16[2,64,2], index: 2, kind: input, shape index: {}]   ;;  %s1899_s3 = inlined_call_operand.vmem [shape: bf16[2,64,2], index: 3, kind: input, shape index: {}]   ;;  %s1900_s4 = inlined_call_operand.vmem [shape: bf16[2,64,3], index: 4, kind: input, shape index: {}]   ;;  %s1901_s5 = inlined_call_operand.vmem [shape: f32[8,2], index: 5, kind: input, shape index: {}]   ;;  %s1902_s6 = inlined_call_operand.vmem [shape: f32[8,1], index: 6, kind: input, shape index: {}]   ;;  %s1903_s7 = inlined_call_operand.hbm [shape: f32[2,8,64], index: 7, kind: output, shape index: {}]  }
   0x1   :  { %12 = sst [smem:[#allocation4]] %s1896_s0 }
   0x2   :  { %13 = vsyncpa [#allocation6], 0 }
   0x3   :  { %15 = vsyncpa [#allocation6 + $0x1], 0  ;;  %s1617_s26 = smov 0   ;;  %s1619_s27 = smov 0  }
   0x4   :  { %s1621_s28 = smov 0   ;;  %s1623_s29 = smov 0  }
   0x5   :  { %s1625_s30 = smov 0   ;;  %s1627_s8 = smov 0  }
   0x6 LB: > { %s1224_s0 = sadd.s32 4294967295, %s1565_s8   ;;  %s1225_s9 = sadd.s32 4294967294, %s1565_s8   ;;  %s1565_s8 = sphi %s1627_s8, %s21_s8   ;;  %s1561_s30 = sphi %s1625_s30, %s1912_s30   ;;  %s1557_s29 = sphi %s1623_s29, %s1911_s29   ;;  %s1553_s28 = sphi %s1621_s28, %s1910_s28   ;;  %s1549_s27 = sphi %s1619_s27, %s1909_s27   ;;  %s1545_s26 = sphi %s1617_s26, %s1908_s26  }
   0x7   : > { %s40_s10 = sadd.s32 1, %s1561_s30  ;;  %s224_s11 = sadd.s32 1, %s1553_s28 }
   0x8   : > { %p42_p0 = scmp.ge.s32.totalorder %s40_s10, 2  ;;  %p234_p1 = scmp.ne.s32.totalorder %s1553_s28, %s1549_s27 }
   0x9   : > { %p235_p2 = scmp.eq.s32.totalorder %s1224_s0, 1  ;;  %p240_p3 = scmp.ne.s32.totalorder %s1549_s27, %s1545_s26 }
   0xa   : > { %s1914_s10 = smov (%p42_p0, %s40_s10), 0  ;;  %p241_p5 = scmp.eq.s32.totalorder %s1225_s9, 1 }
   0xb   : > { %p1657_p4 = por %p235_p2, %p234_p1  ;;  %s219_s13 = ssub.s32 %s1561_s30, %s1914_s10 }
   0xc   : > { %p1228_p6 = scmp.ge.s32.totalorder %s1565_s8, 1  ;;  %p222_p7 = scmp.eq.s32.totalorder %s219_s13, 0 }
   0xd   : > { %p1664_p8 = por %p241_p5, %p240_p3  ;;  %p317_p9 = scmp.lt.s32.totalorder %s1565_s8, 3 }
   0xe   : > { %s1670_s15 = scalar_select %p222_p7, %s1553_s28, %s224_s11  }
   0xf   : > { %p318_p10 = pnand %p1228_p6, %p317_p9 }
  0x10   : > { %p378_p11 = scmp.lt.s32.totalorder (!%p318_p10), %s1557_s29, 1  ;;  %vm494_vm0 = vcmask (!%p318_p10), 15360   ;;  %vm420_vm1 = vcmask (!%p318_p10), 7168   ;;  %v1567_v12 = vmov (!%p318_p10), -inf   ;;  %vm592_vm2 = vcmask (!%p318_p10), 523264   ;;  %s972_s18 = sld [smem:[#allocation4]] (!%p318_p10) }
  0x11   : > { %321 = sbr.rel (%p318_p10) target bundleno = 1204 (0x4b4), region = 48  ;;  %423 = vst.msk [vmem:[#allocation2 + $0x10] sm:$0xff] (!%p318_p10), %vm420_vm1, %v1567_v12  ;;  %421 = vst.msk [vmem:[#allocation2] sm:$0xff] (!%p318_p10), %vm420_vm1, %v1567_v12  ;;  %v1568_v29 = vmov (!%p318_p10), 0   ;;  %vm429_vm3 = vcmask (!%p318_p10), 23552   ;;  %v1569_v63 = vmov (!%p318_p10), 0.0  }
  0x12   : > { %422 = vst.msk [vmem:[#allocation2 + $0x8] sm:$0xff] (!%p318_p10), %vm420_vm1, %v1567_v12  ;;  %424 = vst.msk [vmem:[#allocation2 + $0x18] sm:$0xff] (!%p318_p10), %vm420_vm1, %v1567_v12  ;;  %1430 = vset.pattern.permute.xlu0 (!%p318_p10), %v1568_v29  ;;  %1431 = vset.pattern.permute.xlu1 (!%p318_p10), %v1568_v29  ;;  %vm1572_vm4 = vmmov (!%p318_p10), 0   ;;  %s375_s19 = sand.u32 (!%p318_p10), 1, %s1549_s27   ;;  %s1267_s25 = sshll.u32 (!%p318_p10), %s1557_s29, 7 }
  0x13   : > { %425 = vst.msk [vmem:[#allocation2 + $0x20] sm:$0xff] (!%p318_p10), %vm420_vm1, %v1567_v12  ;;  %426 = vst.msk [vmem:[#allocation2 + $0x28] sm:$0xff] (!%p318_p10), %vm420_vm1, %v1567_v12  ;;  %s1229_s21 = sshll.u32 (!%p318_p10), %s375_s19, 3 }
  0x14   : > { %427 = vst.msk [vmem:[#allocation2 + $0x30] sm:$0xff] (!%p318_p10), %vm420_vm1, %v1567_v12  ;;  %428 = vst.msk [vmem:[#allocation2 + $0x38] sm:$0xff] (!%p318_p10), %vm420_vm1, %v1567_v12 }
  0x15   : > { %431 = vst.msk [vmem:[#allocation3 + $0x8] sm:$0xff] (!%p318_p10), %vm429_vm3, %v1569_v63  ;;  %430 = vst.msk [vmem:[#allocation3] sm:$0xff] (!%p318_p10), %vm429_vm3, %v1569_v63 }
  0x16   : > { %432 = vst.msk [vmem:[#allocation3 + $0x10] sm:$0xff] (!%p318_p10), %vm429_vm3, %v1569_v63  ;;  %433 = vst.msk [vmem:[#allocation3 + $0x18] sm:$0xff] (!%p318_p10), %vm429_vm3, %v1569_v63 }
  0x17   : > { %434 = vst.msk [vmem:[#allocation3 + $0x20] sm:$0xff] (!%p318_p10), %vm429_vm3, %v1569_v63  ;;  %435 = vst.msk [vmem:[#allocation3 + $0x28] sm:$0xff] (!%p318_p10), %vm429_vm3, %v1569_v63 }
  0x18   : > { %s1674_s16 = scalar_select %p378_p11, %s1557_s29, 1  ;;  %v1741_v30 = vld [vmem:[#allocation2 + $0x10] sm:$0xff]  ;;  %v584_v31 = vld [vmem:[#allocation2] sm:$0xff]  ;;  %436 = vst.msk [vmem:[#allocation3 + $0x30] sm:$0xff] %vm429_vm3, %v1569_v63  ;;  %437 = vst.msk [vmem:[#allocation3 + $0x38] sm:$0xff] %vm429_vm3, %v1569_v63 }
  0x19   : > { %v587_v36 = vld [vmem:[#allocation2 + $0x18] sm:$0xff]  ;;  %v585_v37 = vld [vmem:[#allocation2 + $0x8] sm:$0xff]  ;;  %vm1822_vm5 = vmpackc.low %vm494_vm0, %vm494_vm0  ;;  %s1573_s29 = smov [#allocation5]  }
  0x1a   : > { %s1677_s17 = sshll.u32 %s1674_s16, 5  ;;  %v1751_v43 = vld [vmem:[#allocation2 + $0x20] sm:$0xff]  ;;  %v589_v46 = vld [vmem:[#allocation2 + $0x28] sm:$0xff] }
  0x1b   : > { %s403_s20 = scalar_lea.vmem %s1899_s3, %s1677_s17  ;;  %s393_s23 = scalar_lea.vmem %s1898_s2, %s1677_s17  ;;  %v590_v51 = vld [vmem:[#allocation2 + $0x30] sm:$0xff]  ;;  %v591_v52 = vld [vmem:[#allocation2 + $0x38] sm:$0xff] }
  0x1c   : > { %v1435_v0 = vld [vmem:[%s403_s20] sm:$0xff]   ;;  %v1436_v1 = vld [vmem:[%s403_s20 + $0x8] sm:$0xff]   ;;  %v1437_v5 = vld [vmem:[%s403_s20 + $0x10] sm:$0xff]   ;;  %s1759_s0 = scalar_lea.vmem %s1900_s4, %s1677_s17  ;;  %s1082_s17 = scalar_lea.sflag [#allocation6], %s375_s19 }
  0x1d   : > { %1365 = vmatprep.subr.msk.bf16.mxu0 %vm494_vm0, %v1435_v0  ;;  %v508_v2 = vsel %vm494_vm0, %v1435_v0, 0  ;;  %v1439_v3 = vld [vmem:[%s393_s23] sm:$0xff]   ;;  %v511_v4 = vsel %vm494_vm0, %v1436_v1, 0  ;;  %v514_v6 = vsel %vm494_vm0, %v1437_v5, 0  ;;  %v1438_v7 = vld [vmem:[%s403_s20 + $0x18] sm:$0xff]   ;;  %v1440_v9 = vld [vmem:[%s393_s23 + $0x8] sm:$0xff]  }
  0x1e   : > { %1299 = vmatpush3.bf16.xpose.msra.mxu0 %v508_v2  ;;  %1306 = vmatprep.mubr.msk.bf16.mxu0 %vm494_vm0, %v1439_v3  ;;  %v517_v8 = vsel %vm494_vm0, %v1438_v7, 0  ;;  %v1441_v10 = vld [vmem:[%s393_s23 + $0x10] sm:$0xff]   ;;  %v1442_v11 = vld [vmem:[%s393_s23 + $0x18] sm:$0xff]   ;;  %v1443_v54 = vld [vmem:[%s1759_s0] sm:$0xff]   ;;  %s1230_s20 = sshll.u32 %s1674_s16, 3  ;;  %s1848_s16 = scalar_lea.hbm %s1903_s7, %s1267_s25 }
  0x1f   : > { %1366 = vmatprep.subr.msk.bf16.mxu0 %vm494_vm0, %v1436_v1  ;;  %1314 = vmatprep.subr.bf16.mxu1 %v1443_v54  ;;  %v1444_v62 = vld [vmem:[%s1759_s0 + $0x8] sm:$0xff]   ;;  %s384_s24 = scalar_lea.vmem %s1897_s1, %s1230_s20  ;;  %s1491_s20 = sshll.u32 %s1573_s29, 4  ;;  %s1492_s20 = int_to_ptr.vmem [resolvable:$false] %s1491_s20 }
  0x20   : > { %1315 = vmatpush3.bf16.msra.mxu1 %v1443_v54  ;;  %v716_v54 = vld [vmem:[#allocation3 + $0x18] sm:$0xff] }
  0x21   : > { %1316 = vmatprep.subr.bf16.mxu1 %v1444_v62 }
  0x24   : > { %1317 = vmatpush3.bf16.msra.mxu1 %v1444_v62 }
  0x26   : > { %1301 = vmatpush3.bf16.xpose.msra.mxu0 %v511_v4  ;;  %v1445_v4 = vld [vmem:[%s1759_s0 + $0x10] sm:$0xff]  }
  0x27   : > { %1367 = vmatprep.subr.msk.bf16.mxu0 %vm494_vm0, %v1437_v5  ;;  %1318 = vmatprep.subr.bf16.mxu1 %v1445_v4 }
  0x28   : > { %1319 = vmatpush3.bf16.msra.mxu1 %v1445_v4 }
  0x2e   : > { %1303 = vmatpush3.bf16.xpose.msra.mxu0 %v514_v6 }
  0x2f   : > { %1368 = vmatprep.subr.msk.bf16.mxu0 %vm494_vm0, %v1438_v7 }
  0x36   : > { %1305 = vmatpush3.bf16.xpose.msra.mxu0 %v517_v8  ;;  %v1446_v8 = vld [vmem:[%s1759_s0 + $0x18] sm:$0xff]   ;;  %s377_s0 = scalar_lea.vmem [#allocation5], %s1229_s21  ;;  %s1493_s21 = scalar_lea.vmem %s1492_s20, 256 }
  0x37   : > { %1320 = vmatprep.subr.bf16.mxu1 %v1446_v8  ;;  %s1096_s9 = sshll.u32 %s377_s0, 4  ;;  %s1850_s9 = int_to_ptr.vmem [resolvable:$true] %s1096_s9 }
  0x38   : > { %1321 = vmatpush3.bf16.msra.mxu1 %v1446_v8  ;;  %p1494_p1 = scmp.lt.s32.totalorder %s1850_s9, %s1492_s20 }
  0x3d   : > { %1307 = vmatmul.mubr.msk.bf16.vlgmr.msra.gmra.mrb[0].mxu0 %vm494_vm0, %v1440_v9 }
  0x3e   : > { %1310 = vmatprep.mubr.msk.bf16.mxu0 %vm494_vm0, %v1441_v10 }
  0x45   : > { %1311 = vmatmul.mubr.msk.bf16.gmra.mrb[4].mxu0 %vm494_vm0, %v1442_v11 }
 0x110   : > { %v1707_v13 = vpop.f32.mrb[0].mxu0 }
 0x111   : > { %v1709_v14 = vpop.f32.mrb[1].mxu0  ;;  %v599_v15 = vsel %vm592_vm2, %v1707_v13, -inf }
 0x112   : > { %600 = vmax.xlane.f32.xlu1 %v599_v15  ;;  %v1713_v16 = vpop.f32.mrb[2].mxu0  ;;  %v593_v17 = vsel %vm592_vm2, %v1709_v14, -inf }
 0x113   : > { %594 = vmax.xlane.f32.xlu0 %v593_v17  ;;  %v1717_v18 = vpop.f32.mrb[3].mxu0  ;;  %v602_v19 = vsel %vm592_vm2, %v1713_v16, -inf }
 0x114   : > { %v596_v20 = vsel %vm592_vm2, %v1717_v18, -inf }
 0x116   : > { %603 = vmax.xlane.f32.xlu1 %v602_v19 }
 0x117   : > { %597 = vmax.xlane.f32.xlu0 %v596_v20 }
 0x118   : > { %v1723_v21 = vpop.f32.mrb[4].mxu0 }
 0x119   : > { %v1725_v22 = vpop.f32.mrb[5].mxu0  ;;  %v611_v27 = vsel %vm592_vm2, %v1723_v21, -inf }
 0x11a   : > { %v1727_v23 = vpop.f32.mrb[6].mxu0  ;;  %v605_v24 = vsel %vm592_vm2, %v1725_v22, -inf }
 0x11b   : > { %606 = vmax.xlane.f32.xlu0 %v605_v24  ;;  %v1731_v25 = vpop.f32.mrb[7].mxu0  ;;  %v614_v28 = vsel %vm592_vm2, %v1727_v23, -inf }
 0x11c   : > { %v608_v26 = vsel %vm592_vm2, %v1731_v25, -inf }
 0x11d   : > { %609 = vmax.xlane.f32.xlu1 %v608_v26 }
 0x11f   : > { %612 = vmax.xlane.f32.xlu0 %v611_v27 }
 0x121   : > { %615 = vmax.xlane.f32.xlu1 %v614_v28 }
 0x19f   : > { %v601_v32 = vpop.xlane.xlu1 %600 }
 0x1a0   : > { %v1744_v33 = vmax.f32 %v1741_v30, %v601_v32  ;;  %v595_v34 = vpop.xlane.xlu0 %594 }
 0x1a1   : > { %v617_v35 = vmax.f32 %v584_v31, %v595_v34 }
 0x1a2   : > { %898 = vst.msk [vmem:[#allocation2 + $0x10] sm:$0xff] %vm420_vm1, %v1744_v33  ;;  %661 = vperm.xlu1 %1431, %v1744_v33   ;;  %v627_v0 = vsub.f32 %v1741_v30, %v1744_v33 }
 0x1a3   : > { %896 = vst.msk [vmem:[#allocation2] sm:$0xff] %vm420_vm1, %v617_v35  ;;  %v604_v38 = vpop.xlane.xlu1 %603  ;;  %651 = vperm.xlu0 %1430, %v617_v35   ;;  %v625_v55 = vsub.f32 %v584_v31, %v617_v35 }
 0x1a4   : > { %v620_v39 = vmax.f32 %v587_v36, %v604_v38  ;;  %v598_v40 = vpop.xlane.xlu0 %597  ;;  %v637_v5 = vmul.f32 1.442695, %v627_v0 }
 0x1a5   : > { %v618_v41 = vmax.f32 %v585_v37, %v598_v40  ;;  %v633_v1 = vmul.f32 1.442695, %v625_v55 }
 0x1a6   : > { %v628_v42 = vsub.f32 %v587_v36, %v620_v39  ;;  %899 = vst.msk [vmem:[#allocation2 + $0x18] sm:$0xff] %vm420_vm1, %v620_v39 }
 0x1a7   : > { %v626_v44 = vsub.f32 %v585_v37, %v618_v41  ;;  %897 = vst.msk [vmem:[#allocation2 + $0x8] sm:$0xff] %vm420_vm1, %v618_v41  ;;  %656 = vperm.xlu1 %1431, %v618_v41  }
 0x1a8   : > { %v607_v45 = vpop.xlane.xlu0 %606  ;;  %v639_v49 = vmul.f32 1.442695, %v628_v42 }
 0x1a9   : > { %v635_v47 = vmul.f32 1.442695, %v626_v44  ;;  %v621_v48 = vmax.f32 %v1751_v43, %v607_v45 }
 0x1aa   : > { %v610_v50 = vpop.xlane.xlu1 %609 }
 0x1ab   : > { %1447 = vpow2.f32 %v635_v47  ;;  %900 = vst.msk [vmem:[#allocation2 + $0x20] sm:$0xff] %vm420_vm1, %v621_v48  ;;  %v622_v53 = vmax.f32 %v589_v46, %v610_v50  ;;  %666 = vperm.xlu1 %1431, %v620_v39   ;;  %v629_v6 = vsub.f32 %v1751_v43, %v621_v48  ;;  %v1570_v50 = vmov 2  }
 0x1ac   : > { %v613_v56 = vpop.xlane.xlu0 %612  ;;  %1449 = vpow2.f32 %v639_v49 }
 0x1ad   : > { %v630_v57 = vsub.f32 %v589_v46, %v622_v53  ;;  %901 = vst.msk [vmem:[#allocation2 + $0x28] sm:$0xff] %vm420_vm1, %v622_v53  ;;  %v623_v58 = vmax.f32 %v590_v51, %v613_v56  ;;  %v641_v9 = vmul.f32 1.442695, %v629_v6  ;;  %v714_v56 = vld [vmem:[#allocation3 + $0x8] sm:$0xff] }
 0x1ae   : > { %v616_v59 = vpop.xlane.xlu1 %615 }
 0x1af   : > { %v643_v60 = vmul.f32 1.442695, %v630_v57  ;;  %902 = vst.msk [vmem:[#allocation2 + $0x30] sm:$0xff] %vm420_vm1, %v623_v58  ;;  %v624_v61 = vmax.f32 %v591_v52, %v616_v59  ;;  %681 = vperm.xlu1 %1431, %v623_v58   ;;  %v631_v10 = vsub.f32 %v590_v51, %v623_v58 }
 0x1b1   : > { %v632_v2 = vsub.f32 %v591_v52, %v624_v61  ;;  %903 = vst.msk [vmem:[#allocation2 + $0x38] sm:$0xff] %vm420_vm1, %v624_v61  ;;  %1451 = vpow2.f32 %v643_v60  ;;  %v645_v12 = vmul.f32 1.442695, %v631_v10  ;;  %v715_v52 = vld [vmem:[#allocation3 + $0x10] sm:$0xff] }
 0x1b2   : > { %1453 = vpow2.f32 %v633_v1 }
 0x1b3   : > { %v647_v3 = vmul.f32 1.442695, %v632_v2  ;;  %671 = vperm.xlu1 %1431, %v621_v48  }
 0x1b5   : > { %v1448_v7 = vpop.eup %1447  ;;  %1455 = vpow2.f32 %v647_v3 }
 0x1b6   : > { %728 = vperm.xlu0 %1430, %v1448_v7   ;;  %1457 = vpow2.f32 %v637_v5  ;;  %v1450_v11 = vpop.eup %1449 }
 0x1b7   : > { %676 = vperm.xlu1 %1431, %v622_v53   ;;  %1459 = vpow2.f32 %v641_v9  ;;  %v713_v53 = vld [vmem:[#allocation3] sm:$0xff]  ;;  %v719_v9 = vld [vmem:[#allocation3 + $0x30] sm:$0xff] }
 0x1b8   : > { %1461 = vpow2.f32 %v645_v12 }
 0x1ba   : > { %738 = vperm.xlu0 %1430, %v1450_v11   ;;  %v717_v11 = vld [vmem:[#allocation3 + $0x20] sm:$0xff] }
 0x1bb   : > { %686 = vperm.xlu1 %1431, %v624_v61   ;;  %v1452_v15 = vpop.eup %1451 }
 0x1bc   : > { %v1454_v17 = vpop.eup %1453 }
 0x1be   : > { %748 = vperm.xlu0 %1430, %v1452_v15  }
 0x1bf   : > { %723 = vperm.xlu1 %1431, %v1454_v17   ;;  %v1456_v19 = vpop.eup %1455  ;;  %v720_v17 = vld [vmem:[#allocation3 + $0x38] sm:$0xff] }
 0x1c0   : > { %v1458_v20 = vpop.eup %1457 }
 0x1c1   : > { %v1460_v24 = vpop.eup %1459 }
 0x1c2   : > { %758 = vperm.xlu0 %1430, %v1456_v19   ;;  %v1462_v26 = vpop.eup %1461 }
 0x1c3   : > { %733 = vperm.xlu1 %1431, %v1458_v20   ;;  %v718_v20 = vld [vmem:[#allocation3 + $0x28] sm:$0xff] }
 0x1c6   : > { %1433 = vset.pattern.permute.xlu0 %v1570_v50 }
 0x1c7   : > { %743 = vperm.xlu1 %1431, %v1460_v24  }
 0x1cb   : > { %753 = vperm.xlu1 %1431, %v1462_v26  }
 0x1cf   : > { %1432 = vset.pattern.permute.xlu1 %v1570_v50 }
 0x221   : > { %v662_v27 = vpop.permute.xlu1 %661 }
 0x222   : > { %v652_v28 = vpop.permute.xlu0 %651  ;;  %v691_v35 = vsub.f32 %v1707_v13, %v662_v27 }
 0x223   : > { %v689_v31 = vsub.f32 %v1709_v14, %v652_v28 }
 0x226   : > { %v657_v30 = vpop.permute.xlu1 %656 }
 0x227   : > { %v690_v32 = vsub.f32 %v1717_v18, %v657_v30 }
 0x229   : > { %v697_v33 = vpack.c.bf16 %v690_v32, %v689_v31 }
 0x22a   : > { %v667_v34 = vpop.permute.xlu1 %666 }
 0x22b   : > { %v702_v36 = vmul.bf16 1069105081, %v697_v33  ;;  %v692_v37 = vsub.f32 %v1713_v16, %v667_v34 }
 0x22d   : > { %1463 = vpow.bf16 %v702_v36  ;;  %v698_v38 = vpack.c.bf16 %v692_v37, %v691_v35 }
 0x22e   : > { %v682_v39 = vpop.permute.xlu1 %681 }
 0x22f   : > { %v705_v40 = vmul.bf16 1069105081, %v698_v38  ;;  %v695_v13 = vsub.f32 %v1723_v21, %v682_v39 }
 0x231   : > { %1465 = vpow.bf16 %v705_v40 }
 0x232   : > { %v672_v41 = vpop.permute.xlu1 %671 }
 0x233   : > { %v693_v43 = vsub.f32 %v1725_v22, %v672_v41 }
 0x235   : > { %v729_v51 = vpop.permute.xlu0 %728 }
 0x236   : > { %v677_v42 = vpop.permute.xlu1 %676  ;;  %v762_v0 = vmul.f32 %v729_v51, %v714_v56 }
 0x237   : > { %v694_v14 = vsub.f32 %v1731_v25, %v677_v42 }
 0x238   : > { %v1464_v44 = vpop.eup %1463 }
 0x239   : > { %v699_v18 = vpack.c.bf16 %v694_v14, %v693_v43  ;;  %1322 = vmatprep.mubr.msk.bf16.mxu1 %vm592_vm2, %v1464_v44  ;;  %v739_v55 = vpop.permute.xlu0 %738  ;;  %v1571_v43 = vmov 0.0|0.0  }
 0x23a   : > { %v687_v45 = vpop.permute.xlu1 %686  ;;  %v764_v60 = vmul.f32 %v739_v55, %v716_v54  ;;  %1349 = vmatprep.subr.bf16.mxu1 %v1571_v43 }
 0x23b   : > { %v708_v46 = vmul.bf16 1069105081, %v699_v18  ;;  %v696_v16 = vsub.f32 %v1727_v23, %v687_v45 }
 0x23c   : > { %v1466_v47 = vpop.eup %1465 }
 0x23d   : > { %1467 = vpow.bf16 %v708_v46  ;;  %v700_v48 = vpack.c.bf16 %v696_v16, %v695_v13  ;;  %1323 = vmatmul.mubr.msk.bf16.vlgmr.msra.gmra.mrb[0].mxu1 %vm592_vm2, %v1466_v47  ;;  %v749_v7 = vpop.permute.xlu0 %748 }
 0x23e   : > { %v724_v21 = vpop.permute.xlu1 %723  ;;  %v766_v33 = vmul.f32 %v749_v7, %v718_v20  ;;  %v1078_v7 = vld [vmem:[%s384_s24] sm:$0xff] }
 0x23f   : > { %v711_v49 = vmul.bf16 1069105081, %v700_v48  ;;  %v761_v58 = vmul.f32 %v724_v21, %v713_v53  ;;  %v973_v48 = vld [vmem:[%s1902_s6] sm:$0xff] }
 0x241   : > { %1469 = vpow.bf16 %v711_v49  ;;  %v759_v19 = vpop.permute.xlu0 %758 }
 0x242   : > { %v734_v23 = vpop.permute.xlu1 %733  ;;  %v768_v28 = vmul.f32 %v759_v19, %v720_v17 }
 0x243   : > { %v763_v57 = vmul.f32 %v734_v23, %v715_v52 }
 0x246   : > { %v744_v6 = vpop.permute.xlu1 %743 }
 0x247   : > { %v765_v26 = vmul.f32 %v744_v6, %v717_v11 }
 0x248   : > { %v1468_v22 = vpop.eup %1467 }
 0x249   : > { %1326 = vmatprep.mubr.msk.bf16.mxu1 %vm592_vm2, %v1468_v22 }
 0x24a   : > { %v754_v10 = vpop.permute.xlu1 %753 }
 0x24b   : > { %v767_v24 = vmul.f32 %v754_v10, %v719_v9 }
 0x24c   : > { %v1470_v25 = vpop.eup %1469 }
 0x24d   : > { %1327 = vmatmul.mubr.msk.bf16.gmra.mrb[4].mxu1 %vm592_vm2, %v1470_v25 }
 0x24e   : > { %1346 = vmatprep.mubr.msk.f32.mxu1 %vm1572_vm4, %v1569_v63 }
 0x310   : > { %v1324_v59 = vpop.f32.mrb[0].mxu1 }
 0x311   : > { %v880_v61 = vadd.f32 %v1324_v59, %v763_v57  ;;  %v847_v62 = vpop.f32.mrb[1].mxu1 }
 0x312   : > { %v878_v1 = vadd.f32 %v847_v62, %v761_v58  ;;  %v1325_v2 = vpop.f32.mrb[2].mxu1 }
 0x313   : > { %889 = vst.msk [vmem:[#allocation3 + $0x10] sm:$0xff] %vm429_vm3, %v880_v61  ;;  %v881_v3 = vadd.f32 %v1325_v2, %v764_v60  ;;  %v850_v4 = vpop.f32.mrb[3].mxu1 }
 0x314   : > { %887 = vst.msk [vmem:[#allocation3] sm:$0xff] %vm429_vm3, %v878_v1  ;;  %v879_v5 = vadd.f32 %v850_v4, %v762_v0  ;;  %v971_v1 = vld [vmem:[%s1901_s5] sm:$0xff]  ;;  %v1076_v4 = vstv %s972_s18  ;;  %s1487_s18 = scalar_lea.vmem %s1850_s9, 128 }
 0x315   : > { %890 = vst.msk [vmem:[#allocation3 + $0x18] sm:$0xff] %vm429_vm3, %v881_v3  ;;  %p1488_p12 = scmp.ne.s32.totalorder %s1850_s9, %s1487_s18  ;;  %p1495_p2 = scmp.lt.s32.totalorder %s1493_s21, %s1487_s18 }
 0x316   : > { %888 = vst.msk [vmem:[#allocation3 + $0x8] sm:$0xff] %vm429_vm3, %v879_v5 }
 0x317   : > { %p1489_p13 = pnand %p1488_p12, %p1657_p4  ;;  %p1496_p3 = por %p1495_p2, %p1494_p1 }
 0x319   : > { %p1490_p0 = pneg %p1489_p13 }
 0x31a   : > { %v1807_v15 = vld [vmem:[#allocation3 + $0x10] sm:$0xff] }
 0x31b   : > { %v1804_v8 = vld [vmem:[#allocation3] sm:$0xff]  ;;  %p1497_p5 = pnand %p1496_p3, %p1490_p0 }
 0x31c   : > { %1471 = vrcp.f32 %v1804_v8  ;;  %v910_v32 = vld [vmem:[#allocation3 + $0x18] sm:$0xff] }
 0x31d   : > { %v908_v12 = vld [vmem:[#allocation3 + $0x8] sm:$0xff] }
 0x31e   : > { %1473 = vrcp.f32 %v908_v12 }
 0x31f   : > { %1475 = vrcp.f32 %v1807_v15 }
 0x320   : > { %v1328_v27 = vpop.f32.mrb[4].mxu1  ;;  %1477 = vrcp.f32 %v910_v32 }
 0x321   : > { %v884_v30 = vadd.f32 %v1328_v27, %v767_v24  ;;  %v863_v31 = vpop.f32.mrb[5].mxu1 }
 0x322   : > { %v882_v34 = vadd.f32 %v863_v31, %v765_v26  ;;  %v1329_v35 = vpop.f32.mrb[6].mxu1 }
 0x323   : > { %893 = vst.msk [vmem:[#allocation3 + $0x30] sm:$0xff] %vm429_vm3, %v884_v30  ;;  %v885_v36 = vadd.f32 %v1329_v35, %v768_v28  ;;  %v866_v37 = vpop.f32.mrb[7].mxu1 }
 0x324   : > { %891 = vst.msk [vmem:[#allocation3 + $0x20] sm:$0xff] %vm429_vm3, %v882_v34  ;;  %v883_v38 = vadd.f32 %v866_v37, %v766_v33 }
 0x325   : > { %894 = vst.msk [vmem:[#allocation3 + $0x38] sm:$0xff] %vm429_vm3, %v885_v36 }
 0x326   : > { %v1472_v39 = vpop.eup %1471  ;;  %892 = vst.msk [vmem:[#allocation3 + $0x28] sm:$0xff] %vm429_vm3, %v883_v38 }
 0x327   : > { %925 = vperm.xlu1 %1432, %v1472_v39  }
 0x328   : > { %v1474_v40 = vpop.eup %1473 }
 0x329   : > { %930 = vperm.xlu0 %1433, %v1474_v40   ;;  %v1476_v41 = vpop.eup %1475 }
 0x32a   : > { %v913_v44 = vld [vmem:[#allocation3 + $0x30] sm:$0xff]  ;;  %v1478_v18 = vpop.eup %1477 }
 0x32b   : > { %935 = vperm.xlu1 %1432, %v1476_v41   ;;  %v911_v42 = vld [vmem:[#allocation3 + $0x20] sm:$0xff] }
 0x32c   : > { %1479 = vrcp.f32 %v911_v42  ;;  %v914_v45 = vld [vmem:[#allocation3 + $0x38] sm:$0xff] }
 0x32d   : > { %v912_v14 = vld [vmem:[#allocation3 + $0x28] sm:$0xff] }
 0x32e   : > { %1481 = vrcp.f32 %v912_v14 }
 0x32f   : > { %940 = vperm.xlu1 %1432, %v1478_v18   ;;  %1483 = vrcp.f32 %v913_v44 }
 0x330   : > { %1485 = vrcp.f32 %v914_v45 }
 0x336   : > { %v1480_v13 = vpop.eup %1479 }
 0x337   : > { %945 = vperm.xlu0 %1433, %v1480_v13  }
 0x338   : > { %v1482_v46 = vpop.eup %1481 }
 0x339   : > { %950 = vperm.xlu1 %1432, %v1482_v46   ;;  %v1484_v16 = vpop.eup %1483 }
 0x33a   : > { %v1486_v47 = vpop.eup %1485 }
 0x33b   : > { %955 = vperm.xlu0 %1433, %v1484_v16  }
 0x33d   : > { %960 = vperm.xlu1 %1432, %v1486_v47  }
 0x33f   : > { %1434 = vset.pattern.permute.xlu0 %v1568_v29 }
 0x340   : > { %976 = vperm.xlu0 %1434, %v973_v48  }
 0x3a6   : > { %v926_v49 = vpop.permute.xlu1 %925 }
 0x3a7   : > { %v963_v25 = vmul.f32 %v926_v49, %v1804_v8 }
 0x3a8   : > { %v931_v22 = vpop.permute.xlu0 %930 }
 0x3a9   : > { %v964_v50 = vmul.f32 %v931_v22, %v908_v12 }
 0x3aa   : > { %v936_v21 = vpop.permute.xlu1 %935 }
 0x3ab   : > { %v1350_v29 = vpack.c.bf16 %v964_v50, %v963_v25  ;;  %v965_v23 = vmul.f32 %v936_v21, %v1807_v15 }
 0x3ad   : > { %1352 = vmatpush3.bf16.xpose.msk.msra.mxu1 %vm1822_vm5, %v1350_v29 }
 0x3ae   : > { %v941_v63 = vpop.permute.xlu1 %940  ;;  %1353 = vmatprep.subr.bf16.mxu1 %v1571_v43 }
 0x3af   : > { %v966_v52 = vmul.f32 %v941_v63, %v910_v32 }
 0x3b1   : > { %v1354_v53 = vpack.c.bf16 %v966_v52, %v965_v23 }
 0x3b5   : > { %1356 = vmatpush3.bf16.xpose.msk.msra.mxu1 %vm1822_vm5, %v1354_v53 }
 0x3b6   : > { %v946_v54 = vpop.permute.xlu0 %945  ;;  %1357 = vmatprep.subr.bf16.mxu1 %v1571_v43 }
 0x3b7   : > { %v967_v56 = vmul.f32 %v946_v54, %v911_v42 }
 0x3b8   : > { %v951_v55 = vpop.permute.xlu1 %950 }
 0x3b9   : > { %v968_v57 = vmul.f32 %v951_v55, %v912_v14 }
 0x3ba   : > { %v956_v60 = vpop.permute.xlu0 %955 }
 0x3bb   : > { %v1358_v58 = vpack.c.bf16 %v968_v57, %v967_v56  ;;  %v969_v62 = vmul.f32 %v956_v60, %v913_v44 }
 0x3bc   : > { %v961_v59 = vpop.permute.xlu1 %960 }
 0x3bd   : > { %1360 = vmatpush3.bf16.xpose.msk.msra.mxu1 %vm1822_vm5, %v1358_v58  ;;  %v970_v61 = vmul.f32 %v961_v59, %v914_v45 }
 0x3be   : > { %1361 = vmatprep.subr.bf16.mxu1 %v1571_v43 }
 0x3bf   : > { %v1362_v0 = vpack.c.bf16 %v970_v61, %v969_v62  ;;  %v977_v2 = vpop.permute.xlu0 %976 }
 0x3c5   : > { %1364 = vmatpush3.bf16.xpose.msk.msra.mxu1 %vm1822_vm5, %v1362_v0 }
 0x3cc   : > { %1347 = vmatmul.mubr.msk.f32.vlgmr.msra.gmra.mrb[8].mxu1 %vm494_vm0, %v971_v1 }
 0x49f   : > { %v1072_v3 = vpop.f32.mrb[8].mxu1 }
 0x4a0   : > { %v1073_v5 = vadd.f32 %v1072_v3, %v977_v2  ;;  %v1348_v6 = vpop.f32.mrb[9].mxu1 }
 0x4a2   : > { %v1077_v8 = vmul.f32 %v1076_v4, %v1073_v5 }
 0x4a4   : > { %v1079_v9 = vadd.f32 %v1078_v7, %v1077_v8 }
 0x4a6   : > { %1080 = vst.msk [vmem:[%s377_s0] sm:$0xff] %vm592_vm2, %v1079_v9 }
 0x4a7   : > { %1500 = shalt.err (!%p1497_p5)
}
 0x4a8   : > { %s1501_s19 = scalar_lea.hbm %s1848_s16, 128  ;;  %s1505_s24 = scalar_lea.hbm %s1903_s7, 256 }
 0x4a9   : > { %p1502_p6 = scmp.ne.s32.totalorder %s1848_s16, %s1501_s19  ;;  %p1506_p10 = scmp.lt.u32.totalorder %s1848_s16, %s1903_s7 }
 0x4aa   : > { %p1507_p11 = scmp.lt.u32.totalorder %s1505_s24, %s1501_s19  ;;  %p1509_p13 = scmp.lt.u32.totalorder %s1501_s19, %s1848_s16 }
 0x4ab   : > { %p1503_p7 = pnand %p1502_p6, %p1657_p4 }
 0x4ac   : > { %p1508_p12 = por %p1507_p11, %p1506_p10 }
 0x4ad   : > { %p1504_p9 = pneg %p1503_p7 }
 0x4ae   : > { %p1510_p0 = por %p1509_p13, %p1508_p12 }
 0x4b0   : > { %p1511_p1 = pnand %p1510_p0, %p1504_p9 }
 0x4b2   : > { %1514 = shalt.err (!%p1511_p1)
}
 0x4b3   : > { %1369 = dma.vmem_to_hbm [thread:$0]  (%p1657_p4), %s1850_s9, 128, %s1848_s16, %s1082_s17  }
 0x4b4 PF: > { %p1375_p2 = scmp.ge.s32.totalorder %s1565_s8, 2  ;;  %s1108_s11 = sand.u32 1, %s1545_s26  }
 0x4b5   : > { %s1109_s13 = scalar_lea.sflag [#allocation6], %s1108_s11 }
 0x4b6   : > { %p1372_p3 = pnand %p1375_p2, %p1664_p8 }
 0x4b8   : > { %1540 = dma.done.wait (!%p1372_p3), %s1109_s13, 128  }
 0x4b9   : > { %1542 = vsyncadd (!%p1372_p3), %s1109_s13, 4294967168  ;;  %s21_s8 = sadd.s32 1, %s1565_s8   ;;  %s1908_s26 = smov %s1549_s27 }
 0x4ba   : > { %p18_p5 = scmp.ge.s32.totalorder %s21_s8, 4   ;;  %s1909_s27 = smov %s1553_s28 }
 0x4bb   : > { %s1910_s28 = smov %s1670_s15  ;;  %s1911_s29 = smov %s1561_s30 }
 0x4bc   : > { %s1912_s30 = smov %s1914_s10  ;;  %20 = sbr.rel (!%p18_p5) target bundleno = 6 (0x6), region = 100 }
 0x4c3   :  { %1114 = vsyncpa [#allocation6], 1 }
 0x4c4   :  { %1116 = vsyncpa [#allocation6 + $0x1], 1 }

</bundles_post_ra>
